<compile_context>
chip_gen: v7x
topology: tpu7x:2x2x1
jax: 0.10.0
libtpu: 0.0.40
codegen_flags: <defaults>
</compile_context>

<pallas_src>
import functools

import jax
import jax.numpy as jnp
from jax.experimental import pallas as pl
from jax.experimental.pallas import tpu as pltpu

_K = 7   # conv kernel size
_P = 3   # conv padding


def _spatial_attention_kernel(x_ref, g_ref, b_ref, o_ref, *, ck):
    # x_ref / o_ref : (Bt, C, S) VMEM block, S = H*W on the lane axis
    # g_ref         : (2, S, S) f32 VMEM — dense 7x7-conv matrices; [0] for the
    #                 max map, [1] for the mean map (1/C already folded in)
    # b_ref         : (1,) f32 SMEM — conv bias
    Bt, C, S = x_ref.shape
    f32 = jnp.float32
    n_chunks = C // ck
    unroll = n_chunks <= 8

    # ---- pass 1: channel max / sum, chunked over C --------------------------
    # Accumulators keep the channel-chunk axis on sublanes so per-chunk work is
    # pure elementwise VALU; the cross-sublane collapse happens exactly once.
    x0 = x_ref[:, pl.ds(0, ck), :]

    def red_body(i, carry):
        run_max, run_sum = carry
        c0 = pl.multiple_of(i * ck, ck)
        xc = x_ref[:, pl.ds(c0, ck), :]
        return jnp.maximum(run_max, xc), run_sum + xc.astype(f32)

    run_max, run_sum = jax.lax.fori_loop(
        1, n_chunks, red_body, (x0, x0.astype(f32)), unroll=unroll)
    mx = jnp.max(run_max.astype(f32), axis=1)        # (Bt, S) channel max
    sm = jnp.sum(run_sum, axis=1)                     # (Bt, S) channel sum

    # ---- 7x7 conv on the two pooled maps: two small MXU matmuls -------------
    y = (jnp.dot(mx, g_ref[0], preferred_element_type=f32)
         + jnp.dot(sm, g_ref[1], preferred_element_type=f32)
         + b_ref[0])
    gate = jax.nn.sigmoid(y).astype(o_ref.dtype)      # (Bt, S)
    gate_e = gate[:, None, :]                         # hoisted out of pass-2 loop

    # ---- pass 2: gated multiply in the input dtype, chunked over C ----------
    def mul_body(i, _):
        c0 = pl.multiple_of(i * ck, ck)
        o_ref[:, pl.ds(c0, ck), :] = x_ref[:, pl.ds(c0, ck), :] * gate_e
        return 0

    jax.lax.fori_loop(0, n_chunks, mul_body, 0, unroll=unroll)


def _largest_divisor_leq(n, cap):
    cap = int(max(1, min(n, cap)))
    for d in range(cap, 0, -1):
        if n % d == 0:
            return d
    return 1


def _pick_batch_tile(batch, cap):
    """Largest divisor of `batch` <= cap, preferring an even number of grid
    steps (>= 2) so v7x's two TensorCores split the parallel axis evenly."""
    cap = int(max(1, min(batch, cap)))
    divisors = [d for d in range(1, batch + 1) if batch % d == 0 and d <= cap]
    even = [d for d in divisors if (batch // d) >= 2 and (batch // d) % 2 == 0]
    two = [d for d in divisors if (batch // d) >= 2]
    for group in (even, two, divisors):
        if group:
            return max(group)
    return 1


def _vmem_capacity_bytes():
    try:
        return int(pltpu.get_tpu_info().vmem_capacity_bytes)
    except Exception:
        return 64 << 20   # conservative floor: exact for v7x, lower bound elsewhere


def _dense_conv_matrix(kernel_2d, height, width):
    """(H*W, H*W) matrix M with  flat(P) @ M == flat(conv2d(P, kernel, padding=3))
    (cross-correlation, zero padding), for P of shape (H, W) flattened row-major."""
    f32 = jnp.float32
    src_h = jnp.arange(height)[:, None]
    out_h = jnp.arange(height)[None, :]
    dh = src_h - out_h + _P                           # (H_src, H_out)
    vh = (dh >= 0) & (dh < _K)
    src_w = jnp.arange(width)[:, None]
    out_w = jnp.arange(width)[None, :]
    dw = src_w - out_w + _P                           # (W_src, W_out)
    vw = (dw >= 0) & (dw < _K)
    taps = kernel_2d.astype(f32)[jnp.clip(dh, 0, _K - 1)[:, :, None, None],
                                 jnp.clip(dw, 0, _K - 1)[None, None, :, :]]
    taps = jnp.where(vh[:, :, None, None] & vw[None, None, :, :], taps, 0.0)
    # (H_src, H_out, W_src, W_out) -> ((H_src, W_src), (H_out, W_out))
    return taps.transpose(0, 2, 1, 3).reshape(height * width, height * width)


@jax.jit
def spatial_attention(x, conv_w, conv_b):
    """x: (B, C, H, W).  conv_w: (1, 2, 7, 7) PyTorch OIHW, in-ch 0 applies to the
    max map and in-ch 1 to the mean map (this module's cat([max, mean]) order).
    conv_b: (1,)."""
    B, C, H, W = x.shape
    assert conv_w.shape == (1, 2, _K, _K)
    S = H * W
    itemsize = jnp.dtype(x.dtype).itemsize

    # Grid-invariant conv matrices built once in the wrapper: zero padding, the
    # 98 taps, and the 1/C of the mean are all folded in.
    g = jnp.stack([_dense_conv_matrix(conv_w[0, 0], H, W),
                   _dense_conv_matrix(conv_w[0, 1], H, W) * (1.0 / C)])
    b_flat = conv_b.reshape(1).astype(jnp.float32)

    # Lane-dense layout: flatten spatial so the lane axis is H*W, not W.
    x_flat = x.reshape(B, C, S)

    # ---- generation-aware tiling (v5e/v6e: 128 MiB VMEM, v7x: 64 MiB) -------
    vmem_cap = _vmem_capacity_bytes()
    sub_mult = max(1, 32 // itemsize)                 # sublane packing per dtype
    lane_pad = -(-S // 128) * 128
    c_pad = -(-C // sub_mult) * sub_mult
    padded_img_bytes = c_pad * lane_pad * itemsize    # one (1, C, S) image block
    g_bytes = 2 * (-(-S // 8) * 8) * lane_pad * 4     # conv matrices (f32)

    budget = int(0.8 * vmem_cap)
    per_block_target = max(padded_img_bytes,
                           min((budget - 2 * g_bytes) // 4, 16 << 20))
    bt_cap = max(1, per_block_target // padded_img_bytes)
    Bt = _pick_batch_tile(B, bt_cap)

    # Channel chunk for the in-kernel loops: bound live vregs
    # (chunk in native dtype + f32 copy + two f32 accumulators).
    per_c_bytes = Bt * lane_pad * (2 * 4 + 4 + itemsize)
    ck = _largest_divisor_leq(C, max(1, (96 * 1024) // max(1, per_c_bytes)))

    block_bytes = Bt * padded_img_bytes
    vmem_limit = int(min(max(4 * block_bytes + 2 * g_bytes + (2 << 20), 16 << 20),
                         int(0.9 * vmem_cap)))

    kernel = functools.partial(_spatial_attention_kernel, ck=ck)

    out_flat = pl.pallas_call(
        kernel,
        out_shape=jax.ShapeDtypeStruct((B, C, S), x.dtype),
        grid_spec=pltpu.PrefetchScalarGridSpec(
            num_scalar_prefetch=0,
            grid=(B // Bt,),
            in_specs=[
                pl.BlockSpec((Bt, C, S), lambda i: (i, 0, 0)),
                pl.BlockSpec((2, S, S), lambda i: (0, 0, 0)),        # conv matrices
                pl.BlockSpec(memory_space=pltpu.MemorySpace.SMEM),   # conv bias
            ],
            out_specs=pl.BlockSpec((Bt, C, S), lambda i: (i, 0, 0)),
        ),
        compiler_params=pltpu.CompilerParams(
            dimension_semantics=("parallel",),
            vmem_limit_bytes=vmem_limit,
        ),
    )(x_flat, g, b_flat)

    return out_flat.reshape(B, C, H, W)


def _reference(x, conv_w, conv_b):
    max_pool = jnp.max(x, axis=1, keepdims=True)
    avg_pool = jnp.mean(x, axis=1, keepdims=True)
    y = jnp.concatenate([max_pool, avg_pool], axis=1)   # module order: [max, mean]
    y = jax.lax.conv_general_dilated(
        y, conv_w, window_strides=(1, 1),
        padding=((_P, _P), (_P, _P)),
        dimension_numbers=("NCHW", "OIHW", "NCHW"))
    y = y + conv_b.reshape(1, 1, 1, 1)
    return x * jax.nn.sigmoid(y)


if __name__ == "__main__":
    B, C, H, W = 2, 4, 16, 16

    key = jax.random.PRNGKey(0)
    kx, kw, kb = jax.random.split(key, 3)

    x = jax.random.normal(kx, (B, C, H, W), dtype=jnp.float32)
    conv_w = jax.random.normal(kw, (1, 2, _K, _K), dtype=jnp.float32) * 0.1
    conv_b = jax.random.normal(kb, (1,), dtype=jnp.float32) * 0.1

    out = spatial_attention(x, conv_w, conv_b)
    out = jax.block_until_ready(out)

    ref = _reference(x, conv_w, conv_b)
    assert out.shape == (B, C, H, W)
    assert jnp.allclose(out, ref, atol=1e-5, rtol=1e-5), "mismatch vs reference"

    print("KERNEL_OK")
</pallas_src>

<mosaic_0001>
module attributes {stable_mosaic.version = 11 : i64} {
  func.func @_spatial_attention_kernel(%arg0: i32, %arg1: memref<1x4x256xf32, #tpu.memory_space<vmem>>, %arg2: memref<2x256x256xf32, #tpu.memory_space<vmem>>, %arg3: memref<1xf32, #tpu.memory_space<smem>>, %arg4: memref<1x4x256xf32, #tpu.memory_space<vmem>>) attributes {dimension_semantics = [#tpu.dimension_semantics<parallel>], iteration_bounds = array<i64: 2>, scalar_prefetch = 0 : i64, scratch_operands = 0 : i64, tpu.core_type = #tpu.core_type<tc>, window_params = [{transform_indices = @transform_0, window_bounds = array<i64: 1, 4, 256>}, {pipeline_mode = #tpu.pipeline_mode<synchronous>, transform_indices = @transform_1, window_bounds = array<i64: 2, 256, 256>}, {transform_indices = @transform_2, window_bounds = array<i64: 1>}, {transform_indices = @transform_3, window_bounds = array<i64: 1, 4, 256>}]} {
    %c0 = arith.constant 0 : index
    %c0_0 = arith.constant 0 : index
    %c0_1 = arith.constant 0 : index
    %0 = vector.load %arg1[%c0, %c0_0, %c0_1] : memref<1x4x256xf32, #tpu.memory_space<vmem>>, vector<1x4x256xf32>
    %c1_i32 = arith.constant 1 : i32
    %c0_i32 = arith.constant 0 : i32
    %1 = arith.addi %c1_i32, %c0_i32 : i32
    %c1_i32_2 = arith.constant 1 : i32
    %2:2 = scf.for %arg5 = %c1_i32 to %1 step %c1_i32_2 iter_args(%arg6 = %0, %arg7 = %0) -> (vector<1x4x256xf32>, vector<1x4x256xf32>)  : i32 {
      %c4_i32_20 = arith.constant 4 : i32
      %29 = arith.muli %arg5, %c4_i32_20 : i32
      %30 = tpu.assume_multiple %29, 4 : i32
      %c0_21 = arith.constant 0 : index
      %31 = arith.index_cast %30 : i32 to index
      %c0_22 = arith.constant 0 : index
      %32 = vector.load %arg1[%c0_21, %31, %c0_22] : memref<1x4x256xf32, #tpu.memory_space<vmem>>, vector<1x4x256xf32>
      %33 = arith.maximumf %arg6, %32 : vector<1x4x256xf32>
      %34 = arith.addf %arg7, %32 : vector<1x4x256xf32>
      scf.yield %33, %34 : vector<1x4x256xf32>, vector<1x4x256xf32>
    }
    %c0_i32_3 = arith.constant 0 : i32
    %cst = arith.constant dense<0xFF800000> : vector<1x256xf32>
    %3 = vector.multi_reduction <maximumf>, %2#0, %cst [1] : vector<1x4x256xf32> to vector<1x256xf32>
    %cst_4 = arith.constant dense<0.000000e+00> : vector<1x256xf32>
    %4 = vector.multi_reduction <add>, %2#1, %cst_4 [1] : vector<1x4x256xf32> to vector<1x256xf32>
    %c0_5 = arith.constant 0 : index
    %c0_6 = arith.constant 0 : index
    %c0_7 = arith.constant 0 : index
    %5 = vector.load %arg2[%c0_5, %c0_6, %c0_7] : memref<2x256x256xf32, #tpu.memory_space<vmem>>, vector<1x256x256xf32>
    %6 = vector.shape_cast %5 : vector<1x256x256xf32> to vector<256x256xf32>
    %cst_8 = arith.constant dense<0.000000e+00> : vector<1x256xf32>
    %7 = tpu.matmul %3, %6, %cst_8 {dimension_numbers = #tpu.dot_dimension_numbers<[1], [0], [0], [1], [0, 0, 1, 1], [], []>} : vector<1x256xf32>, vector<256x256xf32>, vector<1x256xf32> -> vector<1x256xf32>
    %c1 = arith.constant 1 : index
    %c0_9 = arith.constant 0 : index
    %c0_10 = arith.constant 0 : index
    %8 = vector.load %arg2[%c1, %c0_9, %c0_10] : memref<2x256x256xf32, #tpu.memory_space<vmem>>, vector<1x256x256xf32>
    %9 = vector.shape_cast %8 : vector<1x256x256xf32> to vector<256x256xf32>
    %cst_11 = arith.constant dense<0.000000e+00> : vector<1x256xf32>
    %10 = tpu.matmul %4, %9, %cst_11 {dimension_numbers = #tpu.dot_dimension_numbers<[1], [0], [0], [1], [0, 0, 1, 1], [], []>} : vector<1x256xf32>, vector<256x256xf32>, vector<1x256xf32> -> vector<1x256xf32>
    %11 = arith.addf %7, %10 : vector<1x256xf32>
    %c0_12 = arith.constant 0 : index
    %12 = memref.load %arg3[%c0_12] : memref<1xf32, #tpu.memory_space<smem>>
    %13 = vector.broadcast %12 : f32 to vector<1x256xf32>
    %14 = arith.addf %11, %13 : vector<1x256xf32>
    %15 = arith.negf %14 : vector<1x256xf32>
    %16 = math.exp %15 : vector<1x256xf32>
    %cst_13 = arith.constant 1.000000e+00 : f32
    %17 = vector.broadcast %cst_13 : f32 to vector<1x256xf32>
    %18 = arith.addf %17, %16 : vector<1x256xf32>
    %19 = arith.divf %17, %18 : vector<1x256xf32>
    %20 = vector.shape_cast %19 : vector<1x256xf32> to vector<1x1x256xf32>
    %c0_i32_14 = arith.constant 0 : i32
    %c4_i32 = arith.constant 4 : i32
    %21 = arith.muli %c0_i32_14, %c4_i32 : i32
    %22 = tpu.assume_multiple %21, 4 : i32
    %c0_15 = arith.constant 0 : index
    %23 = arith.index_cast %22 : i32 to index
    %c0_16 = arith.constant 0 : index
    %24 = vector.load %arg1[%c0_15, %23, %c0_16] : memref<1x4x256xf32, #tpu.memory_space<vmem>>, vector<1x4x256xf32>
    %25 = vector.broadcast %20 : vector<1x1x256xf32> to vector<1x4x256xf32>
    %26 = arith.mulf %24, %25 : vector<1x4x256xf32>
    %c0_17 = arith.constant 0 : index
    %27 = arith.index_cast %22 : i32 to index
    %c0_18 = arith.constant 0 : index
    %28 = vector.load %arg4[%c0_17, %27, %c0_18] : memref<1x4x256xf32, #tpu.memory_space<vmem>>, vector<1x4x256xf32>
    tpu.vector_store %arg4[%c0_17, %27, %c0_18], %26 {strides = array<i32>} : memref<1x4x256xf32, #tpu.memory_space<vmem>>, vector<1x4x256xf32>,
    %c1_i32_19 = arith.constant 1 : i32
    return
  }
  func.func @transform_0(%arg0: i32) -> (i32, i32, i32) {
    %c0_i32 = arith.constant 0 : i32
    %c0_i32_0 = arith.constant 0 : i32
    %c0_i32_1 = arith.constant 0 : i32
    return %arg0, %c0_i32, %c0_i32_0 : i32, i32, i32
  }
  func.func @transform_1(%arg0: i32) -> (i32, i32, i32) {
    %c0_i32 = arith.constant 0 : i32
    %c0_i32_0 = arith.constant 0 : i32
    %c0_i32_1 = arith.constant 0 : i32
    %c0_i32_2 = arith.constant 0 : i32
    return %c0_i32, %c0_i32_0, %c0_i32_1 : i32, i32, i32
  }
  func.func @transform_2(%arg0: i32) -> i32 {
    %c0_i32 = arith.constant 0 : i32
    %c0_i32_0 = arith.constant 0 : i32
    return %c0_i32 : i32
  }
  func.func @transform_3(%arg0: i32) -> (i32, i32, i32) {
    %c0_i32 = arith.constant 0 : i32
    %c0_i32_0 = arith.constant 0 : i32
    %c0_i32_1 = arith.constant 0 : i32
    return %arg0, %c0_i32, %c0_i32_0 : i32, i32, i32
  }
}

</mosaic_0001>

<bundles_post_ra>
// kernel: spatial_attention.1
= control target key start
LH: loop header
LB: loop body
LE: loop exit
PB: predicated region body
PF: predicated region fallthrough
CT: control target
= control target key end

     0   :  { %s824_s14 = smov 0   ;;  %s1253_s0 = inlined_call_operand.vmem [shape: f32[2,4,256], index: 0, kind: input, shape index: {}]   ;;  %s1254_s1 = inlined_call_operand.vmem [shape: f32[2,256,256], index: 1, kind: input, shape index: {}]   ;;  %s1255_s2 = inlined_call_operand.<no memory space> [shape: f32[1], index: 2, kind: input, shape index: {}]   ;;  %s1256_s3 = inlined_call_operand.vmem [shape: f32[2,4,256], index: 3, kind: output, shape index: {}]  }
   0x1   :  { %8 = sst [smem:[#allocation2]] %s1255_s2 }
   0x2 LB: > { %s567_s15 = sadd.s32 4294967295, %s799_s14   ;;  %p571_p0 = scmp.ge.s32.totalorder %s799_s14, 1  ;;  %s799_s14 = sphi %s824_s14, %s14_s14  }
   0x3   : > { %p138_p1 = scmp.lt.s32.totalorder %s799_s14, 3 }
   0x5   : > { %p139_p2 = pnand %p571_p0, %p138_p1 }
   0x6   : > { %v577_v0 = vld [vmem:[%s1254_s1 + $0x208] sm:$0xff] (!%p139_p2)  ;;  %v579_v1 = vld [vmem:[%s1254_s1 + $0x218] sm:$0xff] (!%p139_p2)  ;;  %v576_v5 = vld [vmem:[%s1254_s1 + $0x200] sm:$0xff] (!%p139_p2)  ;;  %p1038_p3 = scmp.lt.s32.totalorder (!%p139_p2), %s567_s15, 1  ;;  %vm176_vm0 = vcmask (!%p139_p2), 1043456   ;;  %s476_s19 = sld [smem:[#allocation2]] (!%p139_p2) }
   0x7   : > { %142 = sbr.rel (%p139_p2) target bundleno = 324 (0x144), region = 32  ;;  %v206_v2 = vld [vmem:[%s1254_s1 + $0x8] sm:$0xff] (!%p139_p2)  ;;  %v646_v3 = vpack.c.bf16 (!%p139_p2), %v579_v1, %v577_v0  ;;  %v208_v4 = vld [vmem:[%s1254_s1 + $0x18] sm:$0xff] (!%p139_p2)  ;;  %v578_v6 = vld [vmem:[%s1254_s1 + $0x210] sm:$0xff] (!%p139_p2) }
   0x8   : > { %v710_v7 = vpack.c.bf16 (!%p139_p2), %v208_v4, %v206_v2  ;;  %v648_v8 = vpack.c.bf16 (!%p139_p2), %v578_v6, %v576_v5  ;;  %v205_v9 = vld [vmem:[%s1254_s1] sm:$0xff] (!%p139_p2)  ;;  %v207_v10 = vld [vmem:[%s1254_s1 + $0x10] sm:$0xff] (!%p139_p2)  ;;  %v581_v11 = vld [vmem:[%s1254_s1 + $0x228] sm:$0xff] (!%p139_p2) }
   0x9   : > { %647 = vmatprep.subr.bf16.mxu1 (!%p139_p2), %v646_v3  ;;  %v712_v12 = vpack.c.bf16 (!%p139_p2), %v207_v10, %v205_v9  ;;  %v583_v13 = vld [vmem:[%s1254_s1 + $0x238] sm:$0xff] (!%p139_p2)  ;;  %v210_v14 = vld [vmem:[%s1254_s1 + $0x28] sm:$0xff] (!%p139_p2)  ;;  %v580_v18 = vld [vmem:[%s1254_s1 + $0x220] sm:$0xff] (!%p139_p2) }
   0xa   : > { %v212_v15 = vld [vmem:[%s1254_s1 + $0x38] sm:$0xff] (!%p139_p2)  ;;  %711 = vmatprep.subr.bf16.mxu0 (!%p139_p2), %v710_v7  ;;  %649 = vmatpush1.bf16.msra.mxu1 (!%p139_p2), %v648_v8  ;;  %v650_v16 = vpack.c.bf16 (!%p139_p2), %v583_v13, %v581_v11  ;;  %v582_v19 = vld [vmem:[%s1254_s1 + $0x230] sm:$0xff] (!%p139_p2)  ;;  %v209_v20 = vld [vmem:[%s1254_s1 + $0x20] sm:$0xff] (!%p139_p2) }
   0xb   : > { %v714_v17 = vpack.c.bf16 (!%p139_p2), %v212_v15, %v210_v14  ;;  %713 = vmatpush1.bf16.msra.mxu0 (!%p139_p2), %v712_v12  ;;  %v652_v21 = vpack.c.bf16 (!%p139_p2), %v582_v19, %v580_v18  ;;  %v211_v22 = vld [vmem:[%s1254_s1 + $0x30] sm:$0xff] (!%p139_p2)  ;;  %v585_v23 = vld [vmem:[%s1254_s1 + $0x248] sm:$0xff] (!%p139_p2)  ;;  %v587_v24 = vld [vmem:[%s1254_s1 + $0x258] sm:$0xff] (!%p139_p2) }
   0xc   : > { %651 = vmatprep.subr.bf16.mxu1 (!%p139_p2), %v650_v16  ;;  %v716_v25 = vpack.c.bf16 (!%p139_p2), %v211_v22, %v209_v20  ;;  %v654_v26 = vpack.c.bf16 (!%p139_p2), %v587_v24, %v585_v23  ;;  %v214_v27 = vld [vmem:[%s1254_s1 + $0x48] sm:$0xff] (!%p139_p2)  ;;  %v216_v28 = vld [vmem:[%s1254_s1 + $0x58] sm:$0xff] (!%p139_p2)  ;;  %v584_v29 = vld [vmem:[%s1254_s1 + $0x240] sm:$0xff] (!%p139_p2) }
   0xd   : > { %715 = vmatprep.subr.bf16.mxu0 (!%p139_p2), %v714_v17  ;;  %v718_v30 = vpack.c.bf16 (!%p139_p2), %v216_v28, %v214_v27  ;;  %v586_v31 = vld [vmem:[%s1254_s1 + $0x250] sm:$0xff] (!%p139_p2)  ;;  %v213_v32 = vld [vmem:[%s1254_s1 + $0x40] sm:$0xff] (!%p139_p2)  ;;  %v589_v35 = vld [vmem:[%s1254_s1 + $0x268] sm:$0xff] (!%p139_p2) }
   0xe   : > { %v215_v33 = vld [vmem:[%s1254_s1 + $0x50] sm:$0xff]  ;;  %653 = vmatpush1.bf16.msra.mxu1 %v652_v21  ;;  %v656_v34 = vpack.c.bf16 %v586_v31, %v584_v29  ;;  %v591_v36 = vld [vmem:[%s1254_s1 + $0x278] sm:$0xff]  ;;  %v218_v37 = vld [vmem:[%s1254_s1 + $0x68] sm:$0xff]  ;;  %s1259_s15 = smov (!%p1038_p3, %s567_s15), 1 }
   0xf   : > { %717 = vmatpush1.bf16.msra.mxu0 %v716_v25  ;;  %655 = vmatprep.subr.bf16.mxu1 %v654_v26  ;;  %v720_v38 = vpack.c.bf16 %v215_v33, %v213_v32  ;;  %v658_v39 = vpack.c.bf16 %v591_v36, %v589_v35  ;;  %v220_v40 = vld [vmem:[%s1254_s1 + $0x78] sm:$0xff]  ;;  %v588_v41 = vld [vmem:[%s1254_s1 + $0x260] sm:$0xff]  ;;  %v590_v42 = vld [vmem:[%s1254_s1 + $0x270] sm:$0xff]  ;;  %s644_s28 = sshll.u32 %s1259_s15, 3 }
  0x10   : > { %719 = vmatprep.subr.bf16.mxu0 %v718_v30  ;;  %v722_v43 = vpack.c.bf16 %v220_v40, %v218_v37  ;;  %v217_v44 = vld [vmem:[%s1254_s1 + $0x60] sm:$0xff]  ;;  %v219_v45 = vld [vmem:[%s1254_s1 + $0x70] sm:$0xff]  ;;  %v593_v46 = vld [vmem:[%s1254_s1 + $0x288] sm:$0xff]  ;;  %v660_v50 = vpack.c.bf16 %v590_v42, %v588_v41  ;;  %s166_s21 = scalar_lea.vmem %s1253_s0, %s644_s28  ;;  %s171_s22 = scalar_lea.vmem %s1256_s3, %s644_s28 }
  0x11   : > { %v595_v47 = vld [vmem:[%s1254_s1 + $0x298] sm:$0xff]  ;;  %v222_v48 = vld [vmem:[%s1254_s1 + $0x88] sm:$0xff]  ;;  %v724_v51 = vpack.c.bf16 %v219_v45, %v217_v44  ;;  %v592_v53 = vld [vmem:[%s1254_s1 + $0x280] sm:$0xff] }
  0x12   : > { %v224_v49 = vld [vmem:[%s1254_s1 + $0x98] sm:$0xff]  ;;  %657 = vmatpush1.bf16.msra.mxu1 %v656_v34  ;;  %v662_v52 = vpack.c.bf16 %v595_v47, %v593_v46  ;;  %v594_v54 = vld [vmem:[%s1254_s1 + $0x290] sm:$0xff]  ;;  %v221_v55 = vld [vmem:[%s1254_s1 + $0x80] sm:$0xff] }
  0x13   : > { %721 = vmatpush1.bf16.msra.mxu0 %v720_v38  ;;  %659 = vmatprep.subr.bf16.mxu1 %v658_v39  ;;  %v726_v56 = vpack.c.bf16 %v224_v49, %v222_v48  ;;  %v223_v57 = vld [vmem:[%s1254_s1 + $0x90] sm:$0xff]  ;;  %v597_v58 = vld [vmem:[%s1254_s1 + $0x2a8] sm:$0xff]  ;;  %v599_v59 = vld [vmem:[%s1254_s1 + $0x2b8] sm:$0xff]  ;;  %v664_v62 = vpack.c.bf16 %v594_v54, %v592_v53 }
  0x14   : > { %723 = vmatprep.subr.bf16.mxu0 %v722_v43  ;;  %v226_v60 = vld [vmem:[%s1254_s1 + $0xa8] sm:$0xff]  ;;  %v228_v61 = vld [vmem:[%s1254_s1 + $0xb8] sm:$0xff]  ;;  %v728_v63 = vpack.c.bf16 %v223_v57, %v221_v55  ;;  %v666_v0 = vpack.c.bf16 %v599_v59, %v597_v58  ;;  %v596_v1 = vld [vmem:[%s1254_s1 + $0x2a0] sm:$0xff] }
  0x15   : > { %v598_v2 = vld [vmem:[%s1254_s1 + $0x2b0] sm:$0xff]  ;;  %v225_v3 = vld [vmem:[%s1254_s1 + $0xa0] sm:$0xff]  ;;  %v730_v4 = vpack.c.bf16 %v228_v61, %v226_v60  ;;  %v601_v6 = vld [vmem:[%s1254_s1 + $0x2c8] sm:$0xff] }
  0x16   : > { %661 = vmatpush1.bf16.msra.mxu1 %v660_v50  ;;  %v227_v5 = vld [vmem:[%s1254_s1 + $0xb0] sm:$0xff]  ;;  %v603_v7 = vld [vmem:[%s1254_s1 + $0x2d8] sm:$0xff]  ;;  %v230_v8 = vld [vmem:[%s1254_s1 + $0xc8] sm:$0xff]  ;;  %v668_v10 = vpack.c.bf16 %v598_v2, %v596_v1 }
  0x17   : > { %725 = vmatpush1.bf16.msra.mxu0 %v724_v51  ;;  %663 = vmatprep.subr.bf16.mxu1 %v662_v52  ;;  %v232_v9 = vld [vmem:[%s1254_s1 + $0xd8] sm:$0xff]  ;;  %v732_v11 = vpack.c.bf16 %v227_v5, %v225_v3  ;;  %v670_v12 = vpack.c.bf16 %v603_v7, %v601_v6  ;;  %v600_v13 = vld [vmem:[%s1254_s1 + $0x2c0] sm:$0xff]  ;;  %v602_v14 = vld [vmem:[%s1254_s1 + $0x2d0] sm:$0xff] }
  0x18   : > { %727 = vmatprep.subr.bf16.mxu0 %v726_v56  ;;  %v229_v15 = vld [vmem:[%s1254_s1 + $0xc0] sm:$0xff]  ;;  %v734_v16 = vpack.c.bf16 %v232_v9, %v230_v8  ;;  %v231_v17 = vld [vmem:[%s1254_s1 + $0xd0] sm:$0xff]  ;;  %v605_v18 = vld [vmem:[%s1254_s1 + $0x2e8] sm:$0xff]  ;;  %v672_v22 = vpack.c.bf16 %v602_v14, %v600_v13 }
  0x19   : > { %v607_v19 = vld [vmem:[%s1254_s1 + $0x2f8] sm:$0xff]  ;;  %v234_v20 = vld [vmem:[%s1254_s1 + $0xe8] sm:$0xff]  ;;  %v736_v23 = vpack.c.bf16 %v231_v17, %v229_v15  ;;  %v604_v25 = vld [vmem:[%s1254_s1 + $0x2e0] sm:$0xff] }
  0x1a   : > { %665 = vmatpush1.bf16.msra.mxu1 %v664_v62  ;;  %v236_v21 = vld [vmem:[%s1254_s1 + $0xf8] sm:$0xff]  ;;  %v674_v24 = vpack.c.bf16 %v607_v19, %v605_v18  ;;  %v606_v26 = vld [vmem:[%s1254_s1 + $0x2f0] sm:$0xff]  ;;  %v233_v27 = vld [vmem:[%s1254_s1 + $0xe0] sm:$0xff] }
  0x1b   : > { %729 = vmatpush1.bf16.msra.mxu0 %v728_v63  ;;  %667 = vmatprep.subr.bf16.mxu1 %v666_v0  ;;  %v738_v28 = vpack.c.bf16 %v236_v21, %v234_v20  ;;  %v235_v29 = vld [vmem:[%s1254_s1 + $0xf0] sm:$0xff]  ;;  %v609_v30 = vld [vmem:[%s1254_s1 + $0x308] sm:$0xff]  ;;  %v611_v31 = vld [vmem:[%s1254_s1 + $0x318] sm:$0xff]  ;;  %v676_v34 = vpack.c.bf16 %v606_v26, %v604_v25 }
  0x1c   : > { %731 = vmatprep.subr.bf16.mxu0 %v730_v4  ;;  %v238_v32 = vld [vmem:[%s1254_s1 + $0x108] sm:$0xff]  ;;  %v240_v33 = vld [vmem:[%s1254_s1 + $0x118] sm:$0xff]  ;;  %v740_v35 = vpack.c.bf16 %v235_v29, %v233_v27  ;;  %v678_v36 = vpack.c.bf16 %v611_v31, %v609_v30  ;;  %v608_v37 = vld [vmem:[%s1254_s1 + $0x300] sm:$0xff] }
  0x1d   : > { %v610_v38 = vld [vmem:[%s1254_s1 + $0x310] sm:$0xff]  ;;  %v237_v39 = vld [vmem:[%s1254_s1 + $0x100] sm:$0xff]  ;;  %v742_v40 = vpack.c.bf16 %v240_v33, %v238_v32  ;;  %v613_v42 = vld [vmem:[%s1254_s1 + $0x328] sm:$0xff] }
  0x1e   : > { %669 = vmatpush1.bf16.msra.mxu1 %v668_v10  ;;  %v239_v41 = vld [vmem:[%s1254_s1 + $0x110] sm:$0xff]  ;;  %v615_v43 = vld [vmem:[%s1254_s1 + $0x338] sm:$0xff]  ;;  %v242_v44 = vld [vmem:[%s1254_s1 + $0x128] sm:$0xff]  ;;  %v680_v46 = vpack.c.bf16 %v610_v38, %v608_v37 }
  0x1f   : > { %733 = vmatpush1.bf16.msra.mxu0 %v732_v11  ;;  %671 = vmatprep.subr.bf16.mxu1 %v670_v12  ;;  %v244_v45 = vld [vmem:[%s1254_s1 + $0x138] sm:$0xff]  ;;  %v744_v47 = vpack.c.bf16 %v239_v41, %v237_v39  ;;  %v682_v48 = vpack.c.bf16 %v615_v43, %v613_v42  ;;  %v612_v49 = vld [vmem:[%s1254_s1 + $0x320] sm:$0xff]  ;;  %v614_v50 = vld [vmem:[%s1254_s1 + $0x330] sm:$0xff] }
  0x20   : > { %735 = vmatprep.subr.bf16.mxu0 %v734_v16  ;;  %v241_v51 = vld [vmem:[%s1254_s1 + $0x120] sm:$0xff]  ;;  %v746_v52 = vpack.c.bf16 %v244_v45, %v242_v44  ;;  %v243_v53 = vld [vmem:[%s1254_s1 + $0x130] sm:$0xff]  ;;  %v617_v54 = vld [vmem:[%s1254_s1 + $0x348] sm:$0xff]  ;;  %v684_v58 = vpack.c.bf16 %v614_v50, %v612_v49 }
  0x21   : > { %v619_v55 = vld [vmem:[%s1254_s1 + $0x358] sm:$0xff]  ;;  %v246_v56 = vld [vmem:[%s1254_s1 + $0x148] sm:$0xff]  ;;  %v748_v59 = vpack.c.bf16 %v243_v53, %v241_v51  ;;  %v616_v61 = vld [vmem:[%s1254_s1 + $0x340] sm:$0xff] }
  0x22   : > { %673 = vmatpush1.bf16.msra.mxu1 %v672_v22  ;;  %v248_v57 = vld [vmem:[%s1254_s1 + $0x158] sm:$0xff]  ;;  %v686_v60 = vpack.c.bf16 %v619_v55, %v617_v54  ;;  %v618_v62 = vld [vmem:[%s1254_s1 + $0x350] sm:$0xff]  ;;  %v245_v63 = vld [vmem:[%s1254_s1 + $0x140] sm:$0xff] }
  0x23   : > { %737 = vmatpush1.bf16.msra.mxu0 %v736_v23  ;;  %675 = vmatprep.subr.bf16.mxu1 %v674_v24  ;;  %v750_v0 = vpack.c.bf16 %v248_v57, %v246_v56  ;;  %v247_v1 = vld [vmem:[%s1254_s1 + $0x150] sm:$0xff]  ;;  %v621_v2 = vld [vmem:[%s1254_s1 + $0x368] sm:$0xff]  ;;  %v623_v3 = vld [vmem:[%s1254_s1 + $0x378] sm:$0xff]  ;;  %v688_v6 = vpack.c.bf16 %v618_v62, %v616_v61 }
  0x24   : > { %739 = vmatprep.subr.bf16.mxu0 %v738_v28  ;;  %v250_v4 = vld [vmem:[%s1254_s1 + $0x168] sm:$0xff]  ;;  %v252_v5 = vld [vmem:[%s1254_s1 + $0x178] sm:$0xff]  ;;  %v620_v7 = vld [vmem:[%s1254_s1 + $0x360] sm:$0xff]  ;;  %v752_v8 = vpack.c.bf16 %v247_v1, %v245_v63  ;;  %v690_v9 = vpack.c.bf16 %v623_v3, %v621_v2 }
  0x25   : > { %v622_v10 = vld [vmem:[%s1254_s1 + $0x370] sm:$0xff]  ;;  %v249_v11 = vld [vmem:[%s1254_s1 + $0x160] sm:$0xff]  ;;  %v754_v13 = vpack.c.bf16 %v252_v5, %v250_v4  ;;  %v625_v14 = vld [vmem:[%s1254_s1 + $0x388] sm:$0xff] }
  0x26   : > { %677 = vmatpush1.bf16.msra.mxu1 %v676_v34  ;;  %v251_v12 = vld [vmem:[%s1254_s1 + $0x170] sm:$0xff]  ;;  %v627_v15 = vld [vmem:[%s1254_s1 + $0x398] sm:$0xff]  ;;  %v1144_v16 = vld [vmem:[%s166_s21] sm:$0xff]  ;;  %v692_v22 = vpack.c.bf16 %v622_v10, %v620_v7 }
  0x27   : > { %741 = vmatpush1.bf16.msra.mxu0 %v740_v35  ;;  %679 = vmatprep.subr.bf16.mxu1 %v678_v36  ;;  %v254_v17 = vld [vmem:[%s1254_s1 + $0x188] sm:$0xff]  ;;  %v256_v18 = vld [vmem:[%s1254_s1 + $0x198] sm:$0xff]  ;;  %v174_v19 = vcombine.high %v1144_v16, %v1144_v16  ;;  %v191_v20 = vsel %vm176_vm0, %v1144_v16, 0.0  ;;  %v177_v21 = vsel %vm176_vm0, %v1144_v16, -inf  ;;  %v756_v25 = vpack.c.bf16 %v251_v12, %v249_v11  ;;  %v624_v27 = vld [vmem:[%s1254_s1 + $0x380] sm:$0xff] }
  0x28   : > { %743 = vmatprep.subr.bf16.mxu0 %v742_v40  ;;  %v192_v23 = vrot.slane %v191_v20, 4  ;;  %v178_v24 = vrot.slane %v177_v21, 4  ;;  %v694_v26 = vpack.c.bf16 %v627_v15, %v625_v14  ;;  %v626_v28 = vld [vmem:[%s1254_s1 + $0x390] sm:$0xff]  ;;  %v253_v29 = vld [vmem:[%s1254_s1 + $0x180] sm:$0xff]  ;;  %v758_v32 = vpack.c.bf16 %v256_v18, %v254_v17  ;;  %v629_v34 = vld [vmem:[%s1254_s1 + $0x3a8] sm:$0xff] }
  0x29   : > { %v198_v30 = vsel %vm176_vm0, %v174_v19, 0.0  ;;  %v184_v31 = vsel %vm176_vm0, %v174_v19, -inf  ;;  %v255_v33 = vld [vmem:[%s1254_s1 + $0x190] sm:$0xff]  ;;  %v631_v35 = vld [vmem:[%s1254_s1 + $0x3b8] sm:$0xff]  ;;  %v258_v38 = vld [vmem:[%s1254_s1 + $0x1a8] sm:$0xff]  ;;  %v696_v41 = vpack.c.bf16 %v626_v28, %v624_v27 }
  0x2a   : > { %681 = vmatpush1.bf16.msra.mxu1 %v680_v46  ;;  %v199_v36 = vrot.slane %v198_v30, 4  ;;  %v185_v37 = vrot.slane %v184_v31, 4  ;;  %v260_v39 = vld [vmem:[%s1254_s1 + $0x1b8] sm:$0xff]  ;;  %v193_v40 = vadd.f32 %v192_v23, %v191_v20  ;;  %v179_v44 = vmax.f32 %v177_v21, %v178_v24  ;;  %v257_v49 = vld [vmem:[%s1254_s1 + $0x1a0] sm:$0xff]  ;;  %v259_v51 = vld [vmem:[%s1254_s1 + $0x1b0] sm:$0xff] }
  0x2b   : > { %745 = vmatpush1.bf16.msra.mxu0 %v744_v47  ;;  %683 = vmatprep.subr.bf16.mxu1 %v682_v48  ;;  %v760_v45 = vpack.c.bf16 %v255_v33, %v253_v29  ;;  %v698_v46 = vpack.c.bf16 %v631_v35, %v629_v34  ;;  %v628_v47 = vld [vmem:[%s1254_s1 + $0x3a0] sm:$0xff]  ;;  %v630_v48 = vld [vmem:[%s1254_s1 + $0x3b0] sm:$0xff]  ;;  %v762_v50 = vpack.c.bf16 %v260_v39, %v258_v38  ;;  %v635_v53 = vld [vmem:[%s1254_s1 + $0x3d8] sm:$0xff]  ;;  %v477_v33 = vstv %s476_s19 }
  0x2c   : > { %747 = vmatprep.subr.bf16.mxu0 %v746_v52  ;;  %v200_v42 = vadd.f32 %v199_v36, %v198_v30  ;;  %v186_v43 = vmax.f32 %v184_v31, %v185_v37  ;;  %v633_v52 = vld [vmem:[%s1254_s1 + $0x3c8] sm:$0xff]  ;;  %v264_v57 = vld [vmem:[%s1254_s1 + $0x1d8] sm:$0xff]  ;;  %v180_v62 = vrot.slane %v179_v44, 2  ;;  %v764_v63 = vpack.c.bf16 %v259_v51, %v257_v49  ;;  %v632_v1 = vld [vmem:[%s1254_s1 + $0x3c0] sm:$0xff] }
  0x2d   : > { %v262_v56 = vld [vmem:[%s1254_s1 + $0x1c8] sm:$0xff]  ;;  %v634_v2 = vld [vmem:[%s1254_s1 + $0x3d0] sm:$0xff]  ;;  %v261_v3 = vld [vmem:[%s1254_s1 + $0x1c0] sm:$0xff] }
  0x2e   : > { %685 = vmatpush1.bf16.msra.mxu1 %v684_v58  ;;  %v201_v54 = vrot.slane %v200_v42, 2  ;;  %v187_v55 = vrot.slane %v186_v43, 2  ;;  %v194_v58 = vrot.slane %v193_v40, 2  ;;  %v766_v4 = vpack.c.bf16 %v264_v57, %v262_v56  ;;  %v263_v5 = vld [vmem:[%s1254_s1 + $0x1d0] sm:$0xff]  ;;  %v639_v7 = vld [vmem:[%s1254_s1 + $0x3f8] sm:$0xff]  ;;  %v266_v10 = vld [vmem:[%s1254_s1 + $0x1e8] sm:$0xff] }
  0x2f   : > { %749 = vmatpush1.bf16.msra.mxu0 %v748_v59  ;;  %687 = vmatprep.subr.bf16.mxu1 %v686_v60  ;;  %v700_v59 = vpack.c.bf16 %v630_v48, %v628_v47  ;;  %v268_v11 = vld [vmem:[%s1254_s1 + $0x1f8] sm:$0xff]  ;;  %v181_v17 = vmax.f32 %v179_v44, %v180_v62  ;;  %v768_v18 = vpack.c.bf16 %v263_v5, %v261_v3  ;;  %v636_v20 = vld [vmem:[%s1254_s1 + $0x3e0] sm:$0xff]  ;;  %v638_v21 = vld [vmem:[%s1254_s1 + $0x3f0] sm:$0xff] }
  0x30   : > { %751 = vmatprep.subr.bf16.mxu0 %v750_v0  ;;  %v202_v60 = vadd.f32 %v201_v54, %v200_v42  ;;  %v188_v61 = vmax.f32 %v186_v43, %v187_v55  ;;  %v702_v0 = vpack.c.bf16 %v635_v53, %v633_v52  ;;  %v195_v12 = vadd.f32 %v194_v58, %v193_v40  ;;  %v265_v23 = vld [vmem:[%s1254_s1 + $0x1e0] sm:$0xff]  ;;  %v267_v24 = vld [vmem:[%s1254_s1 + $0x1f0] sm:$0xff] }
  0x31   : > { %v182_v27 = vrot.slane %v181_v17, 1  ;;  %v772_v28 = vpack.c.bf16 %v267_v24, %v265_v23 }
  0x32   : > { %689 = vmatpush1.bf16.msra.mxu1 %v688_v6  ;;  %v637_v6 = vld [vmem:[%s1254_s1 + $0x3e8] sm:$0xff] }
  0x33   : > { %753 = vmatpush1.bf16.msra.mxu0 %v752_v8  ;;  %691 = vmatprep.subr.bf16.mxu1 %v690_v9  ;;  %v203_v8 = vrot.slane %v202_v60, 1  ;;  %v189_v9 = vrot.slane %v188_v61, 1  ;;  %v706_v19 = vpack.c.bf16 %v639_v7, %v637_v6  ;;  %v183_v30 = vmax.f32 %v181_v17, %v182_v27 }
  0x34   : > { %755 = vmatprep.subr.bf16.mxu0 %v754_v13  ;;  %v704_v13 = vpack.c.bf16 %v634_v2, %v632_v1 }
  0x35   : > { %v204_v14 = vadd.f32 %v203_v8, %v202_v60  ;;  %v190_v15 = vmax.f32 %v188_v61, %v189_v9 }
  0x36   : > { %693 = vmatpush1.bf16.msra.mxu1 %v692_v22  ;;  %v770_v22 = vpack.c.bf16 %v268_v11, %v266_v10 }
  0x37   : > { %757 = vmatpush1.bf16.msra.mxu0 %v756_v25  ;;  %695 = vmatprep.subr.bf16.mxu1 %v694_v26  ;;  %v196_v25 = vrot.slane %v195_v12, 1  ;;  %v708_v26 = vpack.c.bf16 %v638_v21, %v636_v20 }
  0x38   : > { %759 = vmatprep.subr.bf16.mxu0 %v758_v32  ;;  %398 = vmatprep.mubr.f32.mxu1 %v204_v14 }
  0x39   : > { %469 = vmatprep.mubr.f32.mxu0 %v190_v15  ;;  %v197_v29 = vadd.f32 %v196_v25, %v195_v12 }
  0x3a   : > { %697 = vmatpush1.bf16.msra.mxu1 %v696_v41 }
  0x3b   : > { %761 = vmatpush1.bf16.msra.mxu0 %v760_v45  ;;  %699 = vmatprep.subr.bf16.mxu1 %v698_v46  ;;  %v496_v45 = vlaneseq }
  0x3c   : > { %763 = vmatprep.subr.bf16.mxu0 %v762_v50 }
  0x3d   : > { %v497_v47 = vshrl.u32 %v496_v45, 7 }
  0x3e   : > { %701 = vmatpush1.bf16.msra.mxu1 %v700_v59 }
  0x3f   : > { %765 = vmatpush1.bf16.msra.mxu0 %v764_v63  ;;  %703 = vmatprep.subr.bf16.mxu1 %v702_v0  ;;  %v498_v48 = vsub.s32 0, %v497_v47 }
  0x40   : > { %767 = vmatprep.subr.bf16.mxu0 %v766_v4 }
  0x42   : > { %705 = vmatpush1.bf16.msra.mxu1 %v704_v13 }
  0x43   : > { %769 = vmatpush1.bf16.msra.mxu0 %v768_v18  ;;  %707 = vmatprep.subr.bf16.mxu1 %v706_v19 }
  0x44   : > { %771 = vmatprep.subr.bf16.mxu0 %v770_v22 }
  0x46   : > { %709 = vmatpush1.bf16.msra.mxu1 %v708_v26 }
  0x47   : > { %773 = vmatpush1.bf16.msra.mxu0 %v772_v28 }
  0x49   : > { %399 = vmatmul.mubr.f32.vlgmr.msra.gmra.mrb[0].mxu1 %v197_v29 }
  0x4a   : > { %470 = vmatmul.mubr.f32.vlgmr.msra.gmra.mrb[0].mxu0 %v183_v30 }
 0x11c   : > { %v400_v31 = vpop.f32.mrb[0].mxu1 }
 0x11d   : > { %v471_v32 = vpop.f32.mrb[0].mxu0  ;;  %v402_v34 = vpop.f32.mrb[1].mxu1 }
 0x11e   : > { %v472_v35 = vadd.f32 %v471_v32, %v400_v31  ;;  %v473_v36 = vpop.f32.mrb[1].mxu0 }
 0x11f   : > { %v474_v37 = vadd.f32 %v473_v36, %v402_v34 }
 0x120   : > { %v478_v38 = vadd.f32 %v477_v33, %v472_v35 }
 0x121   : > { %v479_v39 = vadd.f32 %v477_v33, %v474_v37 }
 0x122   : > { %v640_v40 = vmul.f32 -1.442695, %v478_v38 }
 0x123   : > { %v641_v41 = vmul.f32 -1.442695, %v479_v39 }
 0x124   : > { %785 = vpow2.f32 %v640_v40 }
 0x125   : > { %787 = vpow2.f32 %v641_v41 }
 0x12e   : > { %v786_v42 = vpop.eup %785 }
 0x12f   : > { %v788_v43 = vpop.eup %787  ;;  %v486_v44 = vadd.f32 1.0, %v786_v42 }
 0x130   : > { %v487_v46 = vadd.f32 1.0, %v788_v43 }
 0x131   : > { %789 = vrcp.f32 %v486_v44 }
 0x132   : > { %791 = vrcp.f32 %v487_v46 }
 0x13b   : > { %v790_v49 = vpop.eup %789 }
 0x13c   : > { %v792_v50 = vpop.eup %791  ;;  %v499_v51 = vrot.slane %v790_v49, %v498_v48 }
 0x13d   : > { %v503_v52 = vrot.slane %v792_v50, %v498_v48 }
 0x13f   : > { %v506_v53 = vcombine.low %v499_v51, %v503_v52 }
 0x141   : > { %v508_v54 = vmul.f32 %v506_v53, %v1144_v16 }
 0x143   : > { %511 = vst [vmem:[%s171_s22] sm:$0xff] %v508_v54 }
 0x144 PF: > { %s14_s14 = sadd.s32 1, %s799_s14  }
 0x145   : > { %p11_p4 = scmp.ge.s32.totalorder %s14_s14, 4  }
 0x147   :  { %13 = sbr.rel (!%p11_p4) target bundleno = 2 (0x2), region = 65 }

</bundles_post_ra>
